<compile_context>
chip_gen: v6e
topology: v6e:2x2x1
jax: 0.10.0
libtpu: 0.0.40
codegen_flags: <defaults>
</compile_context>

<pallas_src>
import jax
import jax.numpy as jnp
from jax.experimental import pallas as pl
from jax.experimental.pallas import tpu as pltpu

_TARGET_BLOCK_BYTES = 1 << 20  # ~1 MiB per input block (~4 MiB double-buffered)


def _transform_kernel(scale_ref, bias_ref, x_ref, o_ref):
    # scale/bias: (TM, 1) per-row constants; x/o: (TM, LW) lane-dense tiles.
    o_ref[...] = x_ref[...] * scale_ref[...] + bias_ref[...]


def _pick_tiles(rows, lanes, itemsize):
    """Pick (TM, LW): lane-dense, evenly dividing, ~_TARGET_BLOCK_BYTES/block."""
    # Lane tile: largest multiple of 128 that divides `lanes` under the cap,
    # or the full extent if `lanes` is not 128-aligned (full dims are legal).
    lane_cap = max(128, _TARGET_BLOCK_BYTES // (8 * itemsize))
    if lanes % 128 != 0:
        lw = lanes
    else:
        lw = 128
        m = 256
        while m <= min(lanes, lane_cap):
            if lanes % m == 0:
                lw = m
            m += 128
    # Row tile: largest multiple of 8 that divides `rows` within the byte
    # budget, or the full extent if `rows` is not 8-aligned.
    row_cap = max(8, _TARGET_BLOCK_BYTES // (lw * itemsize))
    if rows % 8 != 0:
        tm = rows
    else:
        tm = 8
        m = 16
        while m <= min(rows, row_cap):
            if rows % m == 0:
                tm = m
            m += 8
    return tm, lw


def transform_layer(x, mean, std):
    """Pallas TPU forward of TransformLayer: (x - mean) / std.

    x: (N, C, H, W); mean/std: (C,) per-channel constants.
    """
    N, C, H, W = x.shape
    R, L = N * C, H * W
    x2 = x.reshape(R, L)  # free for contiguous NCHW

    # y = x * scale + bias with scale = 1/std, bias = -mean/std.
    scale = (1.0 / std).astype(x.dtype)
    bias = (-mean / std).astype(x.dtype)
    scale_rows = jnp.tile(scale, N).reshape(R, 1)  # row r -> channel r % C
    bias_rows = jnp.tile(bias, N).reshape(R, 1)

    itemsize = jnp.dtype(x.dtype).itemsize
    tm, lw = _pick_tiles(R, L, itemsize)
    grid = (pl.cdiv(R, tm), pl.cdiv(L, lw))

    nbytes = x.size * itemsize
    cost = pl.CostEstimate(
        flops=2 * x.size,
        transcendentals=0,
        bytes_accessed=2 * nbytes + 2 * R * itemsize,
    )

    out2 = pl.pallas_call(
        _transform_kernel,
        out_shape=jax.ShapeDtypeStruct((R, L), x.dtype),
        grid=grid,
        in_specs=[
            pl.BlockSpec((tm, 1), lambda i, j: (i, 0)),   # per-row scale
            pl.BlockSpec((tm, 1), lambda i, j: (i, 0)),   # per-row bias
            pl.BlockSpec((tm, lw), lambda i, j: (i, j)),  # x tile
        ],
        out_specs=pl.BlockSpec((tm, lw), lambda i, j: (i, j)),
        compiler_params=pltpu.CompilerParams(
            dimension_semantics=("parallel", "parallel")),
        cost_estimate=cost,
    )(scale_rows, bias_rows, x2)

    return out2.reshape(N, C, H, W)


if __name__ == "__main__":
    # Small shapes: batch=2, channels=4, spatial=16.
    N, C, H, W = 2, 4, 16, 16

    key = jax.random.PRNGKey(0)
    x = jax.random.normal(key, (N, C, H, W), dtype=jnp.float32)

    # Deterministic per-channel normalization constants (ImageNet-like values
    # extended to 4 channels, matching the module's __init__(mean, std)).
    mean = jnp.asarray([0.485, 0.456, 0.406, 0.500], dtype=jnp.float32)
    std = jnp.asarray([0.229, 0.224, 0.225, 0.250], dtype=jnp.float32)

    out = transform_layer(x, mean, std)
    out = jax.block_until_ready(out)

    # Reference (plain JAX, mirrors x.sub(mean).div(std) with [1,C,1,1] bcast).
    ref = (x - mean[None, :, None, None]) / std[None, :, None, None]
    assert out.shape == x.shape and out.dtype == x.dtype
    assert jnp.allclose(out, ref, rtol=1e-5, atol=1e-5)

    print("KERNEL_OK")
</pallas_src>

<mosaic_0001>
module attributes {stable_mosaic.version = 11 : i64} {
  func.func @_transform_kernel(%arg0: i32, %arg1: i32, %arg2: memref<8x1xf32, #tpu.memory_space<vmem>>, %arg3: memref<8x1xf32, #tpu.memory_space<vmem>>, %arg4: memref<8x256xf32, #tpu.memory_space<vmem>>, %arg5: memref<8x256xf32, #tpu.memory_space<vmem>>) attributes {dimension_semantics = [#tpu.dimension_semantics<parallel>, #tpu.dimension_semantics<parallel>], iteration_bounds = array<i64: 1, 1>, scalar_prefetch = 0 : i64, scratch_operands = 0 : i64, tpu.core_type = #tpu.core_type<tc>, window_params = [{transform_indices = @transform_0, window_bounds = array<i64: 8, 1>}, {transform_indices = @transform_1, window_bounds = array<i64: 8, 1>}, {transform_indices = @transform_2, window_bounds = array<i64: 8, 256>}, {transform_indices = @transform_3, window_bounds = array<i64: 8, 256>}]} {
    %c0 = arith.constant 0 : index
    %c0_0 = arith.constant 0 : index
    %0 = vector.load %arg4[%c0, %c0_0] : memref<8x256xf32, #tpu.memory_space<vmem>>, vector<8x256xf32>
    %c0_1 = arith.constant 0 : index
    %c0_2 = arith.constant 0 : index
    %1 = vector.load %arg2[%c0_1, %c0_2] : memref<8x1xf32, #tpu.memory_space<vmem>>, vector<8x1xf32>
    %2 = vector.broadcast %1 : vector<8x1xf32> to vector<8x256xf32>
    %3 = arith.mulf %0, %2 : vector<8x256xf32>
    %c0_3 = arith.constant 0 : index
    %c0_4 = arith.constant 0 : index
    %4 = vector.load %arg3[%c0_3, %c0_4] : memref<8x1xf32, #tpu.memory_space<vmem>>, vector<8x1xf32>
    %5 = vector.broadcast %4 : vector<8x1xf32> to vector<8x256xf32>
    %6 = arith.addf %3, %5 : vector<8x256xf32>
    %c0_5 = arith.constant 0 : index
    %c0_6 = arith.constant 0 : index
    %7 = vector.load %arg5[%c0_5, %c0_6] : memref<8x256xf32, #tpu.memory_space<vmem>>, vector<8x256xf32>
    tpu.vector_store %arg5[%c0_5, %c0_6], %6 {strides = array<i32>} : memref<8x256xf32, #tpu.memory_space<vmem>>, vector<8x256xf32>,
    return
  }
  func.func @transform_0(%arg0: i32, %arg1: i32) -> (i32, i32) {
    %c0_i32 = arith.constant 0 : i32
    %c0_i32_0 = arith.constant 0 : i32
    return %arg0, %c0_i32 : i32, i32
  }
  func.func @transform_1(%arg0: i32, %arg1: i32) -> (i32, i32) {
    %c0_i32 = arith.constant 0 : i32
    %c0_i32_0 = arith.constant 0 : i32
    return %arg0, %c0_i32 : i32, i32
  }
  func.func @transform_2(%arg0: i32, %arg1: i32) -> (i32, i32) {
    %c0_i32 = arith.constant 0 : i32
    return %arg0, %arg1 : i32, i32
  }
  func.func @transform_3(%arg0: i32, %arg1: i32) -> (i32, i32) {
    %c0_i32 = arith.constant 0 : i32
    return %arg0, %arg1 : i32, i32
  }
}

</mosaic_0001>

<bundles_post_ra>
// kernel: tpu_custom_call.1
= control target key start
LH: loop header
LB: loop body
LE: loop exit
PB: predicated region body
PF: predicated region fallthrough
CT: control target
= control target key end

     0   :  { %v74_v1 = vmov 0   ;;  %s111_s0 = inlined_call_operand.vmem [shape: f32[8,1], index: 0, kind: input, shape index: {}]   ;;  %s112_s1 = inlined_call_operand.vmem [shape: f32[8,1], index: 1, kind: input, shape index: {}]   ;;  %s113_s2 = inlined_call_operand.vmem [shape: f32[8,256], index: 2, kind: input, shape index: {}]   ;;  %s114_s3 = inlined_call_operand.hbm [shape: f32[8,256], index: 3, kind: output, shape index: {}]  }
   0x1   :  { %v17_v0 = vld [vmem:[%s111_s0] sm:$0xff]  ;;  %51 = vset.pattern.permute.xlu0 %v74_v1 }
   0x2   :  { %8 = vsyncpa [#allocation3], 0  ;;  %20 = vperm.xlu0 %51, %v17_v0   ;;  %v25_v2 = vld [vmem:[%s112_s1] sm:$0xff]  ;;  %v16_v5 = vld [vmem:[%s113_s2 + $0x8] sm:$0xff]  ;;  %s75_s20 = smov [#allocation2]  }
   0x3   :  { %v15_v4 = vld [vmem:[%s113_s2] sm:$0xff]  ;;  %s41_s0 = sshll.u32 %s75_s20, 4  ;;  %s42_s0 = int_to_ptr.vmem [resolvable:$true] %s41_s0 }
   0x4   :  { %s52_s1 = scalar_lea.vmem %s42_s0, 256  ;;  %p57_p1 = scmp.lt.s32.totalorder %s42_s0, %s42_s0 }
   0x5   :  { %p53_p0 = scmp.ne.s32.totalorder %s42_s0, %s52_s1  ;;  %p58_p2 = scmp.lt.s32.totalorder %s52_s1, %s52_s1 }
   0x6   :  { %28 = vperm.xlu0 %51, %v25_v2  }
   0x7   :  { %p59_p3 = por %p58_p2, %p57_p1 }
   0x9   :  { %p60_p4 = pnand %p59_p3, %p53_p0 }
  0x7d   :  { %v21_v3 = vpop.permute.xlu0 %20 }
  0x7e   :  { %v23_v6 = vmul.f32 %v21_v3, %v15_v4  ;;  %v24_v7 = vmul.f32 %v21_v3, %v16_v5 }
  0x81   :  { %v29_v8 = vpop.permute.xlu0 %28 }
  0x82   :  { %v31_v9 = vadd.f32 %v29_v8, %v23_v6  ;;  %v32_v10 = vadd.f32 %v29_v8, %v24_v7 }
  0x84   :  { %33 = vst [vmem:[#allocation2] sm:$0xff] %v31_v9  ;;  %34 = vst [vmem:[#allocation2 + $0x8] sm:$0xff] %v32_v10 }
  0x85   :  { %63 = shalt.err (!%p60_p4)
}
  0x86   :  { %44 = dma.vmem_to_hbm [thread:$0]  %s42_s0, 256, %s114_s3, [#allocation3]  }
  0x87   :  { %72 = dma.done.wait [#allocation3], 256  }
  0x88   :  { %73 = vsyncadd [#allocation3], 4294967040 }
  0x89   :  { %48 = vsyncpa [#allocation3], 1 }

</bundles_post_ra>
